<compile_context>
chip_gen: v5e
topology: v5e:2x2
jax: 0.10.0
libtpu: 0.0.40
codegen_flags: <defaults>
</compile_context>

<pallas_src>
import math
import jax
import jax.numpy as jnp
from jax.experimental import pallas as pl
from jax.experimental.pallas import tpu as pltpu


def _round_up(a, b):
    return ((a + b - 1) // b) * b


def _timef_kernel(x_ref, w_ref, o_ref):
    # x_ref: (TM, d_inp) f32 ; w_ref: (d_inp, d_model) f32 ; o_ref: (TM, d_model) f32
    o_ref[...] = jnp.dot(
        x_ref[...], w_ref[...], preferred_element_type=jnp.float32
    ).astype(o_ref.dtype)


def time_feature_embedding(x, w, *, tm=256):
    """x: (B, L, d_inp) f32, w: (d_inp, d_model) f32 -> (B, L, d_model) f32."""
    B, L, d_inp = x.shape
    d_model = w.shape[1]
    M = B * L
    xf = x.reshape(M, d_inp)

    # Row tile: multiple of 8 (sublane granularity); pad rows so the grid divides.
    tm_eff = tm if M >= tm else _round_up(M, 8)
    m_pad = _round_up(M, tm_eff)
    if m_pad != M:
        xf = jnp.pad(xf, ((0, m_pad - M), (0, 0)))

    grid = (m_pad // tm_eff,)

    out = pl.pallas_call(
        _timef_kernel,
        out_shape=jax.ShapeDtypeStruct((m_pad, d_model), jnp.float32),
        grid_spec=pltpu.PrefetchScalarGridSpec(
            num_scalar_prefetch=0,
            grid=grid,
            in_specs=[
                pl.BlockSpec((tm_eff, d_inp), lambda i: (i, 0)),     # x row tile
                pl.BlockSpec((d_inp, d_model), lambda i: (0, 0)),    # weight (VMEM-resident)
            ],
            out_specs=pl.BlockSpec((tm_eff, d_model), lambda i: (i, 0)),
        ),
        compiler_params=pltpu.CompilerParams(
            dimension_semantics=("parallel",)),
    )(xf, w)

    return out[:M].reshape(B, L, d_model)


def init_params(key, d_model, freq="h"):
    freq_map = {"h": 4, "t": 5, "s": 6, "m": 1, "a": 1, "w": 2, "d": 3, "b": 3}
    d_inp = freq_map[freq]
    # nn.Linear(d_inp, d_model, bias=False): weight is (d_model, d_inp), init
    # U(-1/sqrt(d_inp), 1/sqrt(d_inp)); stored transposed as (d_inp, d_model).
    bound = 1.0 / math.sqrt(d_inp)
    w = jax.random.uniform(key, (d_inp, d_model), jnp.float32, -bound, bound)
    return {"w": w}


def reference(x, params):
    """Pure-JAX reference of TimeFeatureEmbedding.forward."""
    return x @ params["w"]


if __name__ == "__main__":
    B, L, d_model, freq = 2, 8, 32, "h"
    key = jax.random.PRNGKey(0)
    kp, kx = jax.random.split(key)

    params = init_params(kp, d_model, freq)
    d_inp = params["w"].shape[0]          # 4 for freq='h'
    x = jax.random.normal(kx, (B, L, d_inp), jnp.float32)

    out = time_feature_embedding(x, params["w"])
    out = jax.block_until_ready(out)

    ref = reference(x, params)
    assert out.shape == (B, L, d_model)
    assert jnp.allclose(out, ref, atol=1e-5, rtol=1e-5), "mismatch vs reference"
    print("KERNEL_OK")
</pallas_src>

<mosaic_0001>
module attributes {stable_mosaic.version = 11 : i64} {
  func.func @_timef_kernel(%arg0: i32, %arg1: memref<16x4xf32, #tpu.memory_space<vmem>>, %arg2: memref<4x32xf32, #tpu.memory_space<vmem>>, %arg3: memref<16x32xf32, #tpu.memory_space<vmem>>) attributes {dimension_semantics = [#tpu.dimension_semantics<parallel>], iteration_bounds = array<i64: 1>, scalar_prefetch = 0 : i64, scratch_operands = 0 : i64, tpu.core_type = #tpu.core_type<tc>, window_params = [{transform_indices = @transform_0, window_bounds = array<i64: 16, 4>}, {pipeline_mode = #tpu.pipeline_mode<synchronous>, transform_indices = @transform_1, window_bounds = array<i64: 4, 32>}, {transform_indices = @transform_2, window_bounds = array<i64: 16, 32>}]} {
    %c0 = arith.constant 0 : index
    %c0_0 = arith.constant 0 : index
    %0 = vector.load %arg1[%c0, %c0_0] : memref<16x4xf32, #tpu.memory_space<vmem>>, vector<16x4xf32>
    %c0_1 = arith.constant 0 : index
    %c0_2 = arith.constant 0 : index
    %1 = vector.load %arg2[%c0_1, %c0_2] : memref<4x32xf32, #tpu.memory_space<vmem>>, vector<4x32xf32>
    %cst = arith.constant dense<0.000000e+00> : vector<16x32xf32>
    %2 = tpu.matmul %0, %1, %cst {dimension_numbers = #tpu.dot_dimension_numbers<[1], [0], [0], [1], [0, 0, 1, 1], [], []>} : vector<16x4xf32>, vector<4x32xf32>, vector<16x32xf32> -> vector<16x32xf32>
    %c0_3 = arith.constant 0 : index
    %c0_4 = arith.constant 0 : index
    %3 = vector.load %arg3[%c0_3, %c0_4] : memref<16x32xf32, #tpu.memory_space<vmem>>, vector<16x32xf32>
    tpu.vector_store %arg3[%c0_3, %c0_4], %2 {strides = array<i32>} : memref<16x32xf32, #tpu.memory_space<vmem>>, vector<16x32xf32>,
    return
  }
  func.func @transform_0(%arg0: i32) -> (i32, i32) {
    %c0_i32 = arith.constant 0 : i32
    %c0_i32_0 = arith.constant 0 : i32
    return %arg0, %c0_i32 : i32, i32
  }
  func.func @transform_1(%arg0: i32) -> (i32, i32) {
    %c0_i32 = arith.constant 0 : i32
    %c0_i32_0 = arith.constant 0 : i32
    %c0_i32_1 = arith.constant 0 : i32
    return %c0_i32, %c0_i32_0 : i32, i32
  }
  func.func @transform_2(%arg0: i32) -> (i32, i32) {
    %c0_i32 = arith.constant 0 : i32
    %c0_i32_0 = arith.constant 0 : i32
    return %arg0, %c0_i32 : i32, i32
  }
}

</mosaic_0001>

<bundles_post_ra>
// kernel: tpu_custom_call.1
= control target key start
LH: loop header
LB: loop body
LE: loop exit
PB: predicated region body
PF: predicated region fallthrough
CT: control target
= control target key end

     0   :  { %vm22_vm0 = vcmask 1043456   ;;  %vm15_vm1 = vcmask 31744   ;;  %s133_s0 = inlined_call_operand.vmem [shape: f32[16,4], index: 0, kind: input, shape index: {}]   ;;  %s134_s1 = inlined_call_operand.vmem [shape: f32[4,32], index: 1, kind: input, shape index: {}]   ;;  %s135_s2 = inlined_call_operand.hbm [shape: f32[16,32], index: 2, kind: output, shape index: {}]  }
   0x1   :  { %v14_v0 = vld [vmem:[%s134_s1] sm:$0xf]  ;;  %v13_v2 = vld [vmem:[%s133_s0 + $0x8] sm:$0xff] }
   0x2   :  { %v12_v1 = vld [vmem:[%s133_s0] sm:$0xff]  ;;  %70 = vmatpush.msk.msra.mxu0 %vm22_vm0, %v14_v0  ;;  %73 = vmatpush.msk.msra.mxu1 %vm22_vm0, %v14_v0 }
   0x3   :  { %7 = vsyncpa [#allocation3], 0  ;;  %71 = vmatmul.msk.f32.vlgmr.msra.gmra.mxu0 %vm15_vm1, %v12_v1  ;;  %72 = vmatmul.msk.f32.vlgmr.msra.gmra.mxu1 %vm15_vm1, %v13_v2  ;;  %s103_s15 = smov [#allocation2]   ;;  %s58_s1 = sshll.u32 %s135_s2, 4  ;;  %vm49_vm2 = vcmask 261120   ;;  %s59_s1 = int_to_ptr.hbm [resolvable:$true] %s58_s1 }
   0x4   :  { %s56_s16 = sshll.u32 %s103_s15, 4  ;;  %s104_s19 = smov 128   ;;  %s57_s16 = int_to_ptr.vmem [resolvable:$true] %s56_s16 }
   0x5   :  { %s105_s0 = smov 8  }
  0x80   :  { %v43_v3 = vpop.f32.mrf.mxu0  ;;  %v46_v4 = vpop.f32.mrf.mxu1 }
  0x81   :  { %50 = vst.msk [vmem:[#allocation2] sm:$0xff] %vm49_vm2, %v43_v3 }
  0x82   :  { %51 = vst.msk [vmem:[#allocation2 + $0x8] sm:$0xff] %vm49_vm2, %v46_v4 }
  0x83   :  { %64 = dma.vmem_to_hbm [thread:$0]  %s57_s16, 256, %s59_s1, [#allocation3], %s104_s19, %s104_s19, %s105_s0  }
  0x84   :  { %101 = dma.done.wait [#allocation3], 256  }
  0x85   :  { %102 = vsyncadd [#allocation3], 4294967040 }
  0x86   :  { %69 = vsyncpa [#allocation3], 1 }

</bundles_post_ra>
